<compile_context>
chip_gen: v6e
topology: v6e:2x2x1
jax: 0.10.0
libtpu: 0.0.40
codegen_flags: <defaults>
</compile_context>

<pallas_src>
import functools

import jax
import jax.numpy as jnp
import numpy as np
from jax import lax
from jax.experimental import pallas as pl
from jax.experimental.pallas import tpu as pltpu

_NEG = -1e30  # finite "-inf" so padded class/query/batch lanes never produce NaN


def _round_up(x, m):
    return ((x + m - 1) // m) * m


def _set_criterion_kernel(num_classes, eos_coef, num_queries,
                          logits_ref, pboxes_ref, tboxes_ref, ints_ref, out_ref):
    """One grid step == one batch tile (Bt elements), fully vectorized.

    Shapes (per step):
      logits_ref : [Bt, Qp, Cp] f32, classes lane-dense, padding = -1e30
      pboxes_ref : [Bt, 4, Qp]  f32, component-major predicted boxes (cx,cy,w,h)
      tboxes_ref : [Bt, 4, Mp]  f32, component-major matched target boxes
                   (pre-gathered by tgt_idx on host), padding = 0
      ints_ref   : [Bt, 3, Mp]  i32, rows = (labels, src_idx(-1 pad), batch_valid)
      out_ref    : [1, 8] f32 SMEM, per-tile partial sums
    """
    Bt, Qp, Cp = logits_ref.shape

    logits = logits_ref[...]
    pboxes = pboxes_ref[...]
    tgt_b = tboxes_ref[...]
    ints = ints_ref[...]

    labels = ints[:, 0:1, :]                                   # [Bt,1,Mp] i32
    src_idx = ints[:, 1:2, :]                                  # [Bt,1,Mp] i32
    bvalid = jnp.max(ints[:, 2:3, :].astype(jnp.float32),
                     axis=2, keepdims=True)                    # [Bt,1,1]

    valid_t = (src_idx >= 0).astype(jnp.float32)               # [Bt,1,Mp]

    # ---- one-hot match mask: src_mask[b, q, m] = (src_idx[b, m] == q) ------
    q_iota = lax.broadcasted_iota(jnp.int32, (Bt, Qp, Mp := tgt_b.shape[2]), 1)
    src_mask = src_idx == q_iota                               # [Bt,Qp,Mp]
    src_mask_f = src_mask.astype(jnp.float32)
    q_match = jnp.sum(src_mask_f, axis=2, keepdims=True)       # [Bt,Qp,1]

    # valid-query mask (queries >= num_queries are host padding)
    qvalid = (q_iota[:, :, 0:1] < num_queries).astype(jnp.float32)  # [Bt,Qp,1]

    # ---- target class per query ("no object" where unmatched) --------------
    tc = num_classes + jnp.sum(
        jnp.where(src_mask, labels - num_classes, 0), axis=2, keepdims=True)
    tc_f = tc.astype(jnp.float32)                              # [Bt,Qp,1]

    # ---- weighted cross entropy (F.cross_entropy with empty_weight) --------
    mx = jnp.max(logits, axis=2, keepdims=True)                # [Bt,Qp,1]
    lse = mx + jnp.log(jnp.sum(jnp.exp(logits - mx), axis=2, keepdims=True))
    c_iota = lax.broadcasted_iota(jnp.int32, (Bt, Qp, Cp), 2).astype(jnp.float32)
    tc_onehot = (c_iota == tc_f).astype(jnp.float32)           # [Bt,Qp,Cp]
    picked = jnp.sum(logits * tc_onehot, axis=2, keepdims=True)
    nll = lse - picked
    # empty_weight is ones with eos_coef on the no-object class:
    #   matched query -> weight 1, unmatched -> eos_coef; padded -> 0.
    w_per = (q_match + (1.0 - q_match) * eos_coef) * qvalid    # [Bt,Qp,1]
    ce_num = jnp.sum(bvalid * (w_per * nll))
    ce_den = jnp.sum(bvalid * w_per)

    # ---- argmax class per query (lowest index on ties == torch argmax) -----
    amax = jnp.min(jnp.where(logits == mx, c_iota, float(Cp)),
                   axis=2, keepdims=True)                      # [Bt,Qp,1]

    # ---- class_error on matched queries -------------------------------------
    correct = jnp.sum(q_match * (amax == tc_f).astype(jnp.float32))
    matched = jnp.sum(q_match)

    # ---- cardinality error ---------------------------------------------------
    not_noobj = jnp.where(amax == float(num_classes), 0.0, qvalid)  # [Bt,Qp,1]
    card_pred = jnp.sum(not_noobj, axis=1, keepdims=True)           # [Bt,1,1]
    n_tgt = jnp.sum(valid_t, axis=2, keepdims=True)                 # [Bt,1,1]
    card_sum = jnp.sum(bvalid * jnp.abs(card_pred - n_tgt))

    # ---- box gather for predictions as one batched MXU matmul ---------------
    src_b = jnp.einsum("bcq,bqm->bcm", pboxes, src_mask_f,
                       preferred_element_type=jnp.float32)          # [Bt,4,Mp]
    bbox_sum = jnp.sum(jnp.abs(src_b - tgt_b))     # padded columns are 0 - 0

    # ---- GIoU (diag of generalized_box_iou); components as static slices ----
    def to_xyxy(bx):
        cx, cy, bw, bh = bx[:, 0:1, :], bx[:, 1:2, :], bx[:, 2:3, :], bx[:, 3:4, :]
        return cx - 0.5 * bw, cy - 0.5 * bh, cx + 0.5 * bw, cy + 0.5 * bh

    sx0, sy0, sx1, sy1 = to_xyxy(src_b)
    tx0, ty0, tx1, ty1 = to_xyxy(tgt_b)
    area_s = (sx1 - sx0) * (sy1 - sy0)
    area_t = (tx1 - tx0) * (ty1 - ty0)
    ix0 = jnp.maximum(sx0, tx0)
    iy0 = jnp.maximum(sy0, ty0)
    ix1 = jnp.minimum(sx1, tx1)
    iy1 = jnp.minimum(sy1, ty1)
    inter = jnp.maximum(ix1 - ix0, 0.0) * jnp.maximum(iy1 - iy0, 0.0)
    union = area_s + area_t - inter
    ex0 = jnp.minimum(sx0, tx0)
    ey0 = jnp.minimum(sy0, ty0)
    ex1 = jnp.maximum(sx1, tx1)
    ey1 = jnp.maximum(sy1, ty1)
    area_e = jnp.maximum(ex1 - ex0, 0.0) * jnp.maximum(ey1 - ey0, 0.0)
    # Safe denominators only on padded (all-zero) columns; valid entries untouched.
    union_s = jnp.where(valid_t > 0.5, union, 1.0)
    area_e_s = jnp.where(valid_t > 0.5, area_e, 1.0)
    giou = inter / union_s - (area_e - union) / area_e_s
    giou_sum = jnp.sum(valid_t * (1.0 - giou))

    # ---- per-tile partial sums (finalized on host) ---------------------------
    out_ref[0, 0] = ce_num
    out_ref[0, 1] = ce_den
    out_ref[0, 2] = correct
    out_ref[0, 3] = matched
    out_ref[0, 4] = card_sum
    out_ref[0, 5] = bbox_sum
    out_ref[0, 6] = giou_sum
    out_ref[0, 7] = jnp.float32(0.0)


def set_criterion_losses(pred_logits, pred_boxes, tgt_labels, tgt_boxes,
                         src_idx, tgt_idx, eos_coef, num_classes, num_boxes,
                         batch_tile=None):
    B, Q, C1 = pred_logits.shape
    M = tgt_labels.shape[1]
    assert C1 == num_classes + 1

    Cp = _round_up(C1, 128)   # lane-dense class dim
    Mp = _round_up(M, 128)    # lane-dense target dim
    Qp = _round_up(Q, 8)      # sublane-aligned query dim

    Bt = min(B, 8) if batch_tile is None else max(1, min(batch_tile, B))
    num_tiles = -(-B // Bt)
    Bp = num_tiles * Bt

    f32, i32 = jnp.float32, jnp.int32

    # ---- host-side layout plumbing (padding, transposes, pre-gather) --------
    logits_p = jnp.full((Bp, Qp, Cp), _NEG, f32).at[:B, :Q, :C1].set(
        pred_logits.astype(f32))
    pboxes_p = jnp.zeros((Bp, 4, Qp), f32).at[:B, :, :Q].set(
        jnp.transpose(pred_boxes.astype(f32), (0, 2, 1)))
    # Pre-gather matched target boxes by tgt_idx (removes the [Mp,Mp] one-hot).
    tgt_gather = jnp.take_along_axis(tgt_boxes.astype(f32),
                                     tgt_idx.astype(i32)[:, :, None], axis=1)
    tboxes_p = jnp.zeros((Bp, 4, Mp), f32).at[:B, :, :M].set(
        jnp.transpose(tgt_gather, (0, 2, 1)))
    # Packed integer metadata (single DMA): labels / src_idx / batch-valid flag.
    labels_p = jnp.zeros((Bp, Mp), i32).at[:B, :M].set(tgt_labels.astype(i32))
    src_p = jnp.full((Bp, Mp), -1, i32).at[:B, :M].set(src_idx.astype(i32))
    bval_p = jnp.zeros((Bp, Mp), i32).at[:B, :].set(1)
    ints_p = jnp.stack([labels_p, src_p, bval_p], axis=1)      # [Bp, 3, Mp]

    kernel = functools.partial(_set_criterion_kernel, num_classes,
                               float(eos_coef), Q)

    partials = pl.pallas_call(
        kernel,
        grid=(num_tiles,),
        in_specs=[
            pl.BlockSpec((Bt, Qp, Cp), lambda t: (t, 0, 0)),   # logits
            pl.BlockSpec((Bt, 4, Qp), lambda t: (t, 0, 0)),    # pred boxes (cm)
            pl.BlockSpec((Bt, 4, Mp), lambda t: (t, 0, 0)),    # matched tgt boxes
            pl.BlockSpec((Bt, 3, Mp), lambda t: (t, 0, 0)),    # labels/src_idx/bvalid
        ],
        out_specs=pl.BlockSpec((1, 8), lambda t: (t, 0),
                               memory_space=pltpu.MemorySpace.SMEM),
        out_shape=jax.ShapeDtypeStruct((num_tiles, 8), jnp.float32),
        compiler_params=pltpu.CompilerParams(
            # Independent batch tiles writing disjoint partial rows -> parallel
            # (lets v7x megacore shard tiles across its two TensorCores).
            dimension_semantics=("parallel",)),
    )(logits_p, pboxes_p, tboxes_p, ints_p)

    # ---- finalize on host (5 trivial scalar ops) -----------------------------
    p = jnp.sum(partials, axis=0)
    loss_ce = p[0] / p[1]
    class_error = 100.0 - 100.0 * p[2] / jnp.maximum(p[3], 1.0)
    cardinality_error = p[4] / float(B)
    loss_bbox = p[5] / float(num_boxes)
    loss_giou = p[6] / float(num_boxes)
    return {"loss_ce": loss_ce, "class_error": class_error,
            "cardinality_error": cardinality_error,
            "loss_bbox": loss_bbox, "loss_giou": loss_giou}


def _reference(pred_logits, pred_boxes, tgt_labels, tgt_boxes, src_idx, tgt_idx,
               empty_weight, num_classes, num_boxes):
    """Pure-JAX replica of the PyTorch forward (for validation)."""
    B, Q, C1 = pred_logits.shape
    M = tgt_labels.shape[1]
    b_idx = jnp.repeat(jnp.arange(B), M)
    s_flat = src_idx.reshape(-1)
    t_flat = tgt_idx.reshape(-1)
    tc = jnp.full((B, Q), num_classes, jnp.int32).at[b_idx, s_flat].set(tgt_labels.reshape(-1))
    logp = jax.nn.log_softmax(pred_logits, axis=-1)
    nll = -jnp.take_along_axis(logp, tc[:, :, None], axis=-1)[..., 0]
    w = empty_weight[tc]
    loss_ce = jnp.sum(w * nll) / jnp.sum(w)
    m_logits = pred_logits[b_idx, s_flat]
    acc = 100.0 * jnp.mean((jnp.argmax(m_logits, -1) == tgt_labels.reshape(-1)).astype(jnp.float32))
    class_error = 100.0 - acc
    card_pred = jnp.sum(jnp.argmax(pred_logits, -1) != C1 - 1, axis=1).astype(jnp.float32)
    card_err = jnp.mean(jnp.abs(card_pred - float(M)))
    src_b = pred_boxes[b_idx, s_flat]
    tgt_b = tgt_boxes[b_idx, t_flat]
    loss_bbox = jnp.sum(jnp.abs(src_b - tgt_b)) / num_boxes

    def cxcywh_to_xyxy(x):
        cx, cy, bw, bh = x[:, 0], x[:, 1], x[:, 2], x[:, 3]
        return jnp.stack([cx - 0.5 * bw, cy - 0.5 * bh, cx + 0.5 * bw, cy + 0.5 * bh], -1)

    s = cxcywh_to_xyxy(src_b)
    t = cxcywh_to_xyxy(tgt_b)
    area_s = (s[:, 2] - s[:, 0]) * (s[:, 3] - s[:, 1])
    area_t = (t[:, 2] - t[:, 0]) * (t[:, 3] - t[:, 1])
    wh = jnp.clip(jnp.minimum(s[:, 2:], t[:, 2:]) - jnp.maximum(s[:, :2], t[:, :2]), 0)
    inter = wh[:, 0] * wh[:, 1]
    union = area_s + area_t - inter
    iou = inter / union
    wh_e = jnp.clip(jnp.maximum(s[:, 2:], t[:, 2:]) - jnp.minimum(s[:, :2], t[:, :2]), 0)
    area_e = wh_e[:, 0] * wh_e[:, 1]
    giou = iou - (area_e - union) / area_e
    loss_giou = jnp.sum(1.0 - giou) / num_boxes
    return {"loss_ce": loss_ce, "class_error": class_error,
            "cardinality_error": card_err, "loss_bbox": loss_bbox,
            "loss_giou": loss_giou}


if __name__ == "__main__":
    B, Q, num_classes, M = 2, 10, 4, 3
    C1 = num_classes + 1
    eos_coef = 0.1

    key = jax.random.PRNGKey(0)
    k1, k2, k3, k4, k5, k6 = jax.random.split(key, 6)

    pred_logits = jax.random.normal(k1, (B, Q, C1), jnp.float32)
    pred_boxes = (jax.nn.sigmoid(jax.random.normal(k2, (B, Q, 4), jnp.float32))
                  * 0.5 + 0.25).astype(jnp.float32)

    cxcy = jax.random.uniform(k3, (B, M, 2), minval=0.3, maxval=0.7)
    wh = jax.random.uniform(k4, (B, M, 2), minval=0.1, maxval=0.4)
    tgt_boxes = jnp.concatenate([cxcy, wh], axis=-1).astype(jnp.float32)
    tgt_labels = jax.random.randint(k5, (B, M), 0, num_classes, jnp.int32)

    # Matcher output (Hungarian assignment) provided as deterministic inputs.
    src_idx = jnp.stack(
        [jax.random.permutation(jax.random.fold_in(k6, b), Q)[:M] for b in range(B)]
    ).astype(jnp.int32)
    tgt_idx = jnp.stack(
        [jax.random.permutation(jax.random.fold_in(k6, 100 + b), M) for b in range(B)]
    ).astype(jnp.int32)

    # Module buffer: empty_weight (ones, eos_coef on the no-object class).
    empty_weight = jnp.ones((C1,), jnp.float32).at[-1].set(eos_coef)
    num_boxes = max(B * M, 1)

    ref = _reference(pred_logits, pred_boxes, tgt_labels, tgt_boxes,
                     src_idx, tgt_idx, empty_weight, num_classes, num_boxes)

    # Whole batch in a single grid step (Bt = B).
    losses = set_criterion_losses(pred_logits, pred_boxes, tgt_labels, tgt_boxes,
                                  src_idx, tgt_idx, eos_coef, num_classes, num_boxes)
    jax.block_until_ready(losses)
    for k in losses:
        np.testing.assert_allclose(np.asarray(losses[k]), np.asarray(ref[k]),
                                   rtol=1e-4, atol=1e-4)

    # Multi-tile path (per-tile partials reduced on host; "parallel" batch axis).
    losses2 = set_criterion_losses(pred_logits, pred_boxes, tgt_labels, tgt_boxes,
                                   src_idx, tgt_idx, eos_coef, num_classes,
                                   num_boxes, batch_tile=1)
    jax.block_until_ready(losses2)
    for k in losses2:
        np.testing.assert_allclose(np.asarray(losses2[k]), np.asarray(ref[k]),
                                   rtol=1e-4, atol=1e-4)

    print("KERNEL_OK")
</pallas_src>

<mosaic_0001>
module attributes {stable_mosaic.version = 11 : i64} {
  func.func @_set_criterion_kernel(%arg0: i32, %arg1: memref<2x16x128xf32, #tpu.memory_space<vmem>>, %arg2: memref<2x4x16xf32, #tpu.memory_space<vmem>>, %arg3: memref<2x4x128xf32, #tpu.memory_space<vmem>>, %arg4: memref<2x3x128xi32, #tpu.memory_space<vmem>>, %arg5: memref<1x8xf32, #tpu.memory_space<smem>>) attributes {dimension_semantics = [#tpu.dimension_semantics<parallel>], iteration_bounds = array<i64: 1>, scalar_prefetch = 0 : i64, scratch_operands = 0 : i64, tpu.core_type = #tpu.core_type<tc>, window_params = [{transform_indices = @transform_0, window_bounds = array<i64: 2, 16, 128>}, {transform_indices = @transform_1, window_bounds = array<i64: 2, 4, 16>}, {transform_indices = @transform_2, window_bounds = array<i64: 2, 4, 128>}, {transform_indices = @transform_3, window_bounds = array<i64: 2, 3, 128>}, {transform_indices = @transform_4, window_bounds = array<i64: 1, 8>}]} {
    %c0 = arith.constant 0 : index
    %c0_0 = arith.constant 0 : index
    %c0_1 = arith.constant 0 : index
    %0 = vector.load %arg1[%c0, %c0_0, %c0_1] : memref<2x16x128xf32, #tpu.memory_space<vmem>>, vector<2x16x128xf32>
    %c0_2 = arith.constant 0 : index
    %c0_3 = arith.constant 0 : index
    %c0_4 = arith.constant 0 : index
    %1 = vector.load %arg2[%c0_2, %c0_3, %c0_4] : memref<2x4x16xf32, #tpu.memory_space<vmem>>, vector<2x4x16xf32>
    %c0_5 = arith.constant 0 : index
    %c0_6 = arith.constant 0 : index
    %c0_7 = arith.constant 0 : index
    %2 = vector.load %arg3[%c0_5, %c0_6, %c0_7] : memref<2x4x128xf32, #tpu.memory_space<vmem>>, vector<2x4x128xf32>
    %c0_8 = arith.constant 0 : index
    %c0_9 = arith.constant 0 : index
    %c0_10 = arith.constant 0 : index
    %3 = vector.load %arg4[%c0_8, %c0_9, %c0_10] : memref<2x3x128xi32, #tpu.memory_space<vmem>>, vector<2x3x128xi32>
    %4 = vector.extract_strided_slice %3 {offsets = [0, 0, 0], sizes = [2, 1, 128], strides = [1, 1, 1]} : vector<2x3x128xi32> to vector<2x1x128xi32>
    %5 = vector.extract_strided_slice %3 {offsets = [0, 1, 0], sizes = [2, 1, 128], strides = [1, 1, 1]} : vector<2x3x128xi32> to vector<2x1x128xi32>
    %6 = vector.extract_strided_slice %3 {offsets = [0, 2, 0], sizes = [2, 1, 128], strides = [1, 1, 1]} : vector<2x3x128xi32> to vector<2x1x128xi32>
    %7 = arith.sitofp %6 : vector<2x1x128xi32> to vector<2x1x128xf32>
    %cst = arith.constant dense<0xFF800000> : vector<2x1xf32>
    %8 = vector.multi_reduction <maximumf>, %7, %cst [2] : vector<2x1x128xf32> to vector<2x1xf32>
    %9 = vector.shape_cast %8 : vector<2x1xf32> to vector<2x1x1xf32>
    %c0_i32 = arith.constant 0 : i32
    %10 = vector.broadcast %c0_i32 : i32 to vector<2x1x128xi32>
    %11 = arith.cmpi sge, %5, %10 : vector<2x1x128xi32>
    %12 = arith.extui %11 : vector<2x1x128xi1> to vector<2x1x128xi32>
    %13 = arith.sitofp %12 : vector<2x1x128xi32> to vector<2x1x128xf32>
    %14 = tpu.iota {dimensions = array<i32: 1>} : vector<2x16x128xi32>
    %15 = vector.broadcast %5 : vector<2x1x128xi32> to vector<2x16x128xi32>
    %16 = arith.cmpi eq, %15, %14 : vector<2x16x128xi32>
    %17 = arith.extui %16 : vector<2x16x128xi1> to vector<2x16x128xi32>
    %18 = arith.sitofp %17 : vector<2x16x128xi32> to vector<2x16x128xf32>
    %cst_11 = arith.constant dense<0.000000e+00> : vector<2x16xf32>
    %19 = vector.multi_reduction <add>, %18, %cst_11 [2] : vector<2x16x128xf32> to vector<2x16xf32>
    %20 = vector.shape_cast %19 : vector<2x16xf32> to vector<2x16x1xf32>
    %21 = vector.extract_strided_slice %14 {offsets = [0, 0, 0], sizes = [2, 16, 1], strides = [1, 1, 1]} : vector<2x16x128xi32> to vector<2x16x1xi32>
    %c10_i32 = arith.constant 10 : i32
    %22 = vector.broadcast %c10_i32 : i32 to vector<2x16x1xi32>
    %23 = arith.cmpi slt, %21, %22 : vector<2x16x1xi32>
    %24 = arith.extui %23 : vector<2x16x1xi1> to vector<2x16x1xi32>
    %25 = arith.sitofp %24 : vector<2x16x1xi32> to vector<2x16x1xf32>
    %c4_i32 = arith.constant 4 : i32
    %26 = vector.broadcast %c4_i32 : i32 to vector<2x1x128xi32>
    %27 = arith.subi %4, %26 : vector<2x1x128xi32>
    %c0_i32_12 = arith.constant 0 : i32
    %28 = vector.shape_cast %27 : vector<2x1x128xi32> to vector<2x1x128xi32>
    %29 = vector.broadcast %28 : vector<2x1x128xi32> to vector<2x16x128xi32>
    %30 = vector.broadcast %c0_i32_12 : i32 to vector<2x16x128xi32>
    %31 = arith.select %16, %29, %30 : vector<2x16x128xi1>, vector<2x16x128xi32>
    %cst_13 = arith.constant dense<0> : vector<2x16xi32>
    %32 = vector.multi_reduction <add>, %31, %cst_13 [2] : vector<2x16x128xi32> to vector<2x16xi32>
    %33 = vector.shape_cast %32 : vector<2x16xi32> to vector<2x16x1xi32>
    %c4_i32_14 = arith.constant 4 : i32
    %34 = vector.broadcast %c4_i32_14 : i32 to vector<2x16x1xi32>
    %35 = arith.addi %34, %33 : vector<2x16x1xi32>
    %36 = arith.sitofp %35 : vector<2x16x1xi32> to vector<2x16x1xf32>
    %cst_15 = arith.constant dense<0xFF800000> : vector<2x16xf32>
    %37 = vector.multi_reduction <maximumf>, %0, %cst_15 [2] : vector<2x16x128xf32> to vector<2x16xf32>
    %38 = vector.shape_cast %37 : vector<2x16xf32> to vector<2x16x1xf32>
    %39 = vector.broadcast %38 : vector<2x16x1xf32> to vector<2x16x128xf32>
    %40 = arith.subf %0, %39 : vector<2x16x128xf32>
    %41 = math.exp %40 : vector<2x16x128xf32>
    %cst_16 = arith.constant dense<0.000000e+00> : vector<2x16xf32>
    %42 = vector.multi_reduction <add>, %41, %cst_16 [2] : vector<2x16x128xf32> to vector<2x16xf32>
    %43 = vector.shape_cast %42 : vector<2x16xf32> to vector<2x16x1xf32>
    %44 = math.log %43 : vector<2x16x1xf32>
    %45 = arith.addf %38, %44 : vector<2x16x1xf32>
    %46 = tpu.iota {dimensions = array<i32: 2>} : vector<2x16x128xi32>
    %47 = arith.sitofp %46 : vector<2x16x128xi32> to vector<2x16x128xf32>
    %48 = vector.broadcast %36 : vector<2x16x1xf32> to vector<2x16x128xf32>
    %49 = arith.cmpf oeq, %47, %48 : vector<2x16x128xf32>
    %50 = arith.extui %49 : vector<2x16x128xi1> to vector<2x16x128xi32>
    %51 = arith.sitofp %50 : vector<2x16x128xi32> to vector<2x16x128xf32>
    %52 = arith.mulf %0, %51 : vector<2x16x128xf32>
    %cst_17 = arith.constant dense<0.000000e+00> : vector<2x16xf32>
    %53 = vector.multi_reduction <add>, %52, %cst_17 [2] : vector<2x16x128xf32> to vector<2x16xf32>
    %54 = vector.shape_cast %53 : vector<2x16xf32> to vector<2x16x1xf32>
    %55 = arith.subf %45, %54 : vector<2x16x1xf32>
    %cst_18 = arith.constant 1.000000e+00 : f32
    %56 = vector.broadcast %cst_18 : f32 to vector<2x16x1xf32>
    %57 = arith.subf %56, %20 : vector<2x16x1xf32>
    %cst_19 = arith.constant 1.000000e-01 : f32
    %58 = vector.broadcast %cst_19 : f32 to vector<2x16x1xf32>
    %59 = arith.mulf %57, %58 : vector<2x16x1xf32>
    %60 = arith.addf %20, %59 : vector<2x16x1xf32>
    %61 = arith.mulf %60, %25 : vector<2x16x1xf32>
    %62 = arith.mulf %61, %55 : vector<2x16x1xf32>
    %63 = vector.broadcast %9 : vector<2x1x1xf32> to vector<2x16x1xf32>
    %64 = arith.mulf %63, %62 : vector<2x16x1xf32>
    %65 = vector.shape_cast %64 : vector<2x16x1xf32> to vector<1x2x16x1xf32>
    %cst_20 = arith.constant dense<0.000000e+00> : vector<1xf32>
    %66 = vector.multi_reduction <add>, %65, %cst_20 [1, 2, 3] : vector<1x2x16x1xf32> to vector<1xf32>
    %67 = vector.shape_cast %66 : vector<1xf32> to vector<1x1x1x1xf32>
    %68 = vector.extract %67[0, 0, 0, 0] : f32 from vector<1x1x1x1xf32>
    %69 = vector.broadcast %9 : vector<2x1x1xf32> to vector<2x16x1xf32>
    %70 = arith.mulf %69, %61 : vector<2x16x1xf32>
    %71 = vector.shape_cast %70 : vector<2x16x1xf32> to vector<1x2x16x1xf32>
    %cst_21 = arith.constant dense<0.000000e+00> : vector<1xf32>
    %72 = vector.multi_reduction <add>, %71, %cst_21 [1, 2, 3] : vector<1x2x16x1xf32> to vector<1xf32>
    %73 = vector.shape_cast %72 : vector<1xf32> to vector<1x1x1x1xf32>
    %74 = vector.extract %73[0, 0, 0, 0] : f32 from vector<1x1x1x1xf32>
    %75 = vector.broadcast %38 : vector<2x16x1xf32> to vector<2x16x128xf32>
    %76 = arith.cmpf oeq, %0, %75 : vector<2x16x128xf32>
    %cst_22 = arith.constant 1.280000e+02 : f32
    %77 = vector.broadcast %cst_22 : f32 to vector<2x16x128xf32>
    %78 = arith.select %76, %47, %77 : vector<2x16x128xi1>, vector<2x16x128xf32>
    %cst_23 = arith.constant dense<0x7F800000> : vector<2x16xf32>
    %79 = vector.multi_reduction <minimumf>, %78, %cst_23 [2] : vector<2x16x128xf32> to vector<2x16xf32>
    %80 = vector.shape_cast %79 : vector<2x16xf32> to vector<2x16x1xf32>
    %81 = arith.cmpf oeq, %80, %36 : vector<2x16x1xf32>
    %82 = arith.extui %81 : vector<2x16x1xi1> to vector<2x16x1xi32>
    %83 = arith.sitofp %82 : vector<2x16x1xi32> to vector<2x16x1xf32>
    %84 = arith.mulf %20, %83 : vector<2x16x1xf32>
    %85 = vector.shape_cast %84 : vector<2x16x1xf32> to vector<1x2x16x1xf32>
    %cst_24 = arith.constant dense<0.000000e+00> : vector<1xf32>
    %86 = vector.multi_reduction <add>, %85, %cst_24 [1, 2, 3] : vector<1x2x16x1xf32> to vector<1xf32>
    %87 = vector.shape_cast %86 : vector<1xf32> to vector<1x1x1x1xf32>
    %88 = vector.extract %87[0, 0, 0, 0] : f32 from vector<1x1x1x1xf32>
    %89 = vector.shape_cast %20 : vector<2x16x1xf32> to vector<1x2x16x1xf32>
    %cst_25 = arith.constant dense<0.000000e+00> : vector<1xf32>
    %90 = vector.multi_reduction <add>, %89, %cst_25 [1, 2, 3] : vector<1x2x16x1xf32> to vector<1xf32>
    %91 = vector.shape_cast %90 : vector<1xf32> to vector<1x1x1x1xf32>
    %92 = vector.extract %91[0, 0, 0, 0] : f32 from vector<1x1x1x1xf32>
    %cst_26 = arith.constant 4.000000e+00 : f32
    %93 = vector.broadcast %cst_26 : f32 to vector<2x16x1xf32>
    %94 = arith.cmpf oeq, %80, %93 : vector<2x16x1xf32>
    %cst_27 = arith.constant 0.000000e+00 : f32
    %95 = vector.broadcast %cst_27 : f32 to vector<2x16x1xf32>
    %96 = arith.select %94, %95, %25 : vector<2x16x1xi1>, vector<2x16x1xf32>
    %cst_28 = arith.constant dense<0.000000e+00> : vector<2x1xf32>
    %97 = vector.multi_reduction <add>, %96, %cst_28 [1] : vector<2x16x1xf32> to vector<2x1xf32>
    %98 = vector.shape_cast %97 : vector<2x1xf32> to vector<2x1x1xf32>
    %cst_29 = arith.constant dense<0.000000e+00> : vector<2x1xf32>
    %99 = vector.multi_reduction <add>, %13, %cst_29 [2] : vector<2x1x128xf32> to vector<2x1xf32>
    %100 = vector.shape_cast %99 : vector<2x1xf32> to vector<2x1x1xf32>
    %101 = arith.subf %98, %100 : vector<2x1x1xf32>
    %102 = math.absf %101 : vector<2x1x1xf32>
    %103 = arith.mulf %9, %102 : vector<2x1x1xf32>
    %104 = vector.shape_cast %103 : vector<2x1x1xf32> to vector<1x2x1x1xf32>
    %cst_30 = arith.constant dense<0.000000e+00> : vector<1xf32>
    %105 = vector.multi_reduction <add>, %104, %cst_30 [1, 2, 3] : vector<1x2x1x1xf32> to vector<1xf32>
    %106 = vector.shape_cast %105 : vector<1xf32> to vector<1x1x1x1xf32>
    %107 = vector.extract %106[0, 0, 0, 0] : f32 from vector<1x1x1x1xf32>
    "tpu.trace_start"() <{level = 10 : i32, message = "bcq,bqm->bcm"}> : () -> ()
    %cst_31 = arith.constant dense<0.000000e+00> : vector<2x4x128xf32>
    %108 = tpu.matmul %1, %18, %cst_31 {dimension_numbers = #tpu.dot_dimension_numbers<[2], [1], [1], [2], [0, 0, 0, 1, 1, 2], [0], [0]>} : vector<2x4x16xf32>, vector<2x16x128xf32>, vector<2x4x128xf32> -> vector<2x4x128xf32>
    "tpu.trace_stop"() : () -> ()
    %109 = arith.subf %108, %2 : vector<2x4x128xf32>
    %110 = math.absf %109 : vector<2x4x128xf32>
    %111 = vector.shape_cast %110 : vector<2x4x128xf32> to vector<1x2x4x128xf32>
    %cst_32 = arith.constant dense<0.000000e+00> : vector<1xf32>
    %112 = vector.multi_reduction <add>, %111, %cst_32 [1, 2, 3] : vector<1x2x4x128xf32> to vector<1xf32>
    %113 = vector.shape_cast %112 : vector<1xf32> to vector<1x1x1x1xf32>
    %114 = vector.extract %113[0, 0, 0, 0] : f32 from vector<1x1x1x1xf32>
    %115 = vector.extract_strided_slice %108 {offsets = [0, 0, 0], sizes = [2, 1, 128], strides = [1, 1, 1]} : vector<2x4x128xf32> to vector<2x1x128xf32>
    %116 = vector.extract_strided_slice %108 {offsets = [0, 1, 0], sizes = [2, 1, 128], strides = [1, 1, 1]} : vector<2x4x128xf32> to vector<2x1x128xf32>
    %117 = vector.extract_strided_slice %108 {offsets = [0, 2, 0], sizes = [2, 1, 128], strides = [1, 1, 1]} : vector<2x4x128xf32> to vector<2x1x128xf32>
    %118 = vector.extract_strided_slice %108 {offsets = [0, 3, 0], sizes = [2, 1, 128], strides = [1, 1, 1]} : vector<2x4x128xf32> to vector<2x1x128xf32>
    %cst_33 = arith.constant 5.000000e-01 : f32
    %119 = vector.broadcast %cst_33 : f32 to vector<2x1x128xf32>
    %120 = arith.mulf %119, %117 : vector<2x1x128xf32>
    %121 = arith.subf %115, %120 : vector<2x1x128xf32>
    %cst_34 = arith.constant 5.000000e-01 : f32
    %122 = vector.broadcast %cst_34 : f32 to vector<2x1x128xf32>
    %123 = arith.mulf %122, %118 : vector<2x1x128xf32>
    %124 = arith.subf %116, %123 : vector<2x1x128xf32>
    %cst_35 = arith.constant 5.000000e-01 : f32
    %125 = vector.broadcast %cst_35 : f32 to vector<2x1x128xf32>
    %126 = arith.mulf %125, %117 : vector<2x1x128xf32>
    %127 = arith.addf %115, %126 : vector<2x1x128xf32>
    %cst_36 = arith.constant 5.000000e-01 : f32
    %128 = vector.broadcast %cst_36 : f32 to vector<2x1x128xf32>
    %129 = arith.mulf %128, %118 : vector<2x1x128xf32>
    %130 = arith.addf %116, %129 : vector<2x1x128xf32>
    %131 = vector.extract_strided_slice %2 {offsets = [0, 0, 0], sizes = [2, 1, 128], strides = [1, 1, 1]} : vector<2x4x128xf32> to vector<2x1x128xf32>
    %132 = vector.extract_strided_slice %2 {offsets = [0, 1, 0], sizes = [2, 1, 128], strides = [1, 1, 1]} : vector<2x4x128xf32> to vector<2x1x128xf32>
    %133 = vector.extract_strided_slice %2 {offsets = [0, 2, 0], sizes = [2, 1, 128], strides = [1, 1, 1]} : vector<2x4x128xf32> to vector<2x1x128xf32>
    %134 = vector.extract_strided_slice %2 {offsets = [0, 3, 0], sizes = [2, 1, 128], strides = [1, 1, 1]} : vector<2x4x128xf32> to vector<2x1x128xf32>
    %cst_37 = arith.constant 5.000000e-01 : f32
    %135 = vector.broadcast %cst_37 : f32 to vector<2x1x128xf32>
    %136 = arith.mulf %135, %133 : vector<2x1x128xf32>
    %137 = arith.subf %131, %136 : vector<2x1x128xf32>
    %cst_38 = arith.constant 5.000000e-01 : f32
    %138 = vector.broadcast %cst_38 : f32 to vector<2x1x128xf32>
    %139 = arith.mulf %138, %134 : vector<2x1x128xf32>
    %140 = arith.subf %132, %139 : vector<2x1x128xf32>
    %cst_39 = arith.constant 5.000000e-01 : f32
    %141 = vector.broadcast %cst_39 : f32 to vector<2x1x128xf32>
    %142 = arith.mulf %141, %133 : vector<2x1x128xf32>
    %143 = arith.addf %131, %142 : vector<2x1x128xf32>
    %cst_40 = arith.constant 5.000000e-01 : f32
    %144 = vector.broadcast %cst_40 : f32 to vector<2x1x128xf32>
    %145 = arith.mulf %144, %134 : vector<2x1x128xf32>
    %146 = arith.addf %132, %145 : vector<2x1x128xf32>
    %147 = arith.subf %127, %121 : vector<2x1x128xf32>
    %148 = arith.subf %130, %124 : vector<2x1x128xf32>
    %149 = arith.mulf %147, %148 : vector<2x1x128xf32>
    %150 = arith.subf %143, %137 : vector<2x1x128xf32>
    %151 = arith.subf %146, %140 : vector<2x1x128xf32>
    %152 = arith.mulf %150, %151 : vector<2x1x128xf32>
    %153 = arith.maximumf %121, %137 : vector<2x1x128xf32>
    %154 = arith.maximumf %124, %140 : vector<2x1x128xf32>
    %155 = arith.minimumf %127, %143 : vector<2x1x128xf32>
    %156 = arith.minimumf %130, %146 : vector<2x1x128xf32>
    %157 = arith.subf %155, %153 : vector<2x1x128xf32>
    %cst_41 = arith.constant 0.000000e+00 : f32
    %158 = vector.broadcast %cst_41 : f32 to vector<2x1x128xf32>
    %159 = arith.maximumf %157, %158 : vector<2x1x128xf32>
    %160 = arith.subf %156, %154 : vector<2x1x128xf32>
    %cst_42 = arith.constant 0.000000e+00 : f32
    %161 = vector.broadcast %cst_42 : f32 to vector<2x1x128xf32>
    %162 = arith.maximumf %160, %161 : vector<2x1x128xf32>
    %163 = arith.mulf %159, %162 : vector<2x1x128xf32>
    %164 = arith.addf %149, %152 : vector<2x1x128xf32>
    %165 = arith.subf %164, %163 : vector<2x1x128xf32>
    %166 = arith.minimumf %121, %137 : vector<2x1x128xf32>
    %167 = arith.minimumf %124, %140 : vector<2x1x128xf32>
    %168 = arith.maximumf %127, %143 : vector<2x1x128xf32>
    %169 = arith.maximumf %130, %146 : vector<2x1x128xf32>
    %170 = arith.subf %168, %166 : vector<2x1x128xf32>
    %cst_43 = arith.constant 0.000000e+00 : f32
    %171 = vector.broadcast %cst_43 : f32 to vector<2x1x128xf32>
    %172 = arith.maximumf %170, %171 : vector<2x1x128xf32>
    %173 = arith.subf %169, %167 : vector<2x1x128xf32>
    %cst_44 = arith.constant 0.000000e+00 : f32
    %174 = vector.broadcast %cst_44 : f32 to vector<2x1x128xf32>
    %175 = arith.maximumf %173, %174 : vector<2x1x128xf32>
    %176 = arith.mulf %172, %175 : vector<2x1x128xf32>
    %cst_45 = arith.constant 5.000000e-01 : f32
    %177 = vector.broadcast %cst_45 : f32 to vector<2x1x128xf32>
    %178 = arith.cmpf ogt, %13, %177 : vector<2x1x128xf32>
    %cst_46 = arith.constant 1.000000e+00 : f32
    %179 = vector.broadcast %cst_46 : f32 to vector<2x1x128xf32>
    %180 = arith.select %178, %165, %179 : vector<2x1x128xi1>, vector<2x1x128xf32>
    %cst_47 = arith.constant 5.000000e-01 : f32
    %181 = vector.broadcast %cst_47 : f32 to vector<2x1x128xf32>
    %182 = arith.cmpf ogt, %13, %181 : vector<2x1x128xf32>
    %cst_48 = arith.constant 1.000000e+00 : f32
    %183 = vector.broadcast %cst_48 : f32 to vector<2x1x128xf32>
    %184 = arith.select %182, %176, %183 : vector<2x1x128xi1>, vector<2x1x128xf32>
    %185 = arith.divf %163, %180 : vector<2x1x128xf32>
    %186 = arith.subf %176, %165 : vector<2x1x128xf32>
    %187 = arith.divf %186, %184 : vector<2x1x128xf32>
    %188 = arith.subf %185, %187 : vector<2x1x128xf32>
    %cst_49 = arith.constant 1.000000e+00 : f32
    %189 = vector.broadcast %cst_49 : f32 to vector<2x1x128xf32>
    %190 = arith.subf %189, %188 : vector<2x1x128xf32>
    %191 = arith.mulf %13, %190 : vector<2x1x128xf32>
    %192 = vector.shape_cast %191 : vector<2x1x128xf32> to vector<1x2x1x128xf32>
    %cst_50 = arith.constant dense<0.000000e+00> : vector<1xf32>
    %193 = vector.multi_reduction <add>, %192, %cst_50 [1, 2, 3] : vector<1x2x1x128xf32> to vector<1xf32>
    %194 = vector.shape_cast %193 : vector<1xf32> to vector<1x1x1x1xf32>
    %195 = vector.extract %194[0, 0, 0, 0] : f32 from vector<1x1x1x1xf32>
    %c0_51 = arith.constant 0 : index
    %c0_52 = arith.constant 0 : index
    %196 = memref.load %arg5[%c0_51, %c0_52] : memref<1x8xf32, #tpu.memory_space<smem>>
    memref.store %68, %arg5[%c0_51, %c0_52] : memref<1x8xf32, #tpu.memory_space<smem>>
    %c0_53 = arith.constant 0 : index
    %c1 = arith.constant 1 : index
    %197 = memref.load %arg5[%c0_53, %c1] : memref<1x8xf32, #tpu.memory_space<smem>>
    memref.store %74, %arg5[%c0_53, %c1] : memref<1x8xf32, #tpu.memory_space<smem>>
    %c0_54 = arith.constant 0 : index
    %c2 = arith.constant 2 : index
    %198 = memref.load %arg5[%c0_54, %c2] : memref<1x8xf32, #tpu.memory_space<smem>>
    memref.store %88, %arg5[%c0_54, %c2] : memref<1x8xf32, #tpu.memory_space<smem>>
    %c0_55 = arith.constant 0 : index
    %c3 = arith.constant 3 : index
    %199 = memref.load %arg5[%c0_55, %c3] : memref<1x8xf32, #tpu.memory_space<smem>>
    memref.store %92, %arg5[%c0_55, %c3] : memref<1x8xf32, #tpu.memory_space<smem>>
    %c0_56 = arith.constant 0 : index
    %c4 = arith.constant 4 : index
    %200 = memref.load %arg5[%c0_56, %c4] : memref<1x8xf32, #tpu.memory_space<smem>>
    memref.store %107, %arg5[%c0_56, %c4] : memref<1x8xf32, #tpu.memory_space<smem>>
    %c0_57 = arith.constant 0 : index
    %c5 = arith.constant 5 : index
    %201 = memref.load %arg5[%c0_57, %c5] : memref<1x8xf32, #tpu.memory_space<smem>>
    memref.store %114, %arg5[%c0_57, %c5] : memref<1x8xf32, #tpu.memory_space<smem>>
    %c0_58 = arith.constant 0 : index
    %c6 = arith.constant 6 : index
    %202 = memref.load %arg5[%c0_58, %c6] : memref<1x8xf32, #tpu.memory_space<smem>>
    memref.store %195, %arg5[%c0_58, %c6] : memref<1x8xf32, #tpu.memory_space<smem>>
    %cst_59 = arith.constant 0.000000e+00 : f32
    %c0_60 = arith.constant 0 : index
    %c7 = arith.constant 7 : index
    %203 = memref.load %arg5[%c0_60, %c7] : memref<1x8xf32, #tpu.memory_space<smem>>
    memref.store %cst_59, %arg5[%c0_60, %c7] : memref<1x8xf32, #tpu.memory_space<smem>>
    return
  }
  func.func @transform_0(%arg0: i32) -> (i32, i32, i32) {
    %c0_i32 = arith.constant 0 : i32
    %c0_i32_0 = arith.constant 0 : i32
    %c0_i32_1 = arith.constant 0 : i32
    return %arg0, %c0_i32, %c0_i32_0 : i32, i32, i32
  }
  func.func @transform_1(%arg0: i32) -> (i32, i32, i32) {
    %c0_i32 = arith.constant 0 : i32
    %c0_i32_0 = arith.constant 0 : i32
    %c0_i32_1 = arith.constant 0 : i32
    return %arg0, %c0_i32, %c0_i32_0 : i32, i32, i32
  }
  func.func @transform_2(%arg0: i32) -> (i32, i32, i32) {
    %c0_i32 = arith.constant 0 : i32
    %c0_i32_0 = arith.constant 0 : i32
    %c0_i32_1 = arith.constant 0 : i32
    return %arg0, %c0_i32, %c0_i32_0 : i32, i32, i32
  }
  func.func @transform_3(%arg0: i32) -> (i32, i32, i32) {
    %c0_i32 = arith.constant 0 : i32
    %c0_i32_0 = arith.constant 0 : i32
    %c0_i32_1 = arith.constant 0 : i32
    return %arg0, %c0_i32, %c0_i32_0 : i32, i32, i32
  }
  func.func @transform_4(%arg0: i32) -> (i32, i32) {
    %c0_i32 = arith.constant 0 : i32
    %c0_i32_0 = arith.constant 0 : i32
    return %arg0, %c0_i32 : i32, i32
  }
}

</mosaic_0001>

<bundles_post_ra>
// kernel: tpu_custom_call.1
= control target key start
LH: loop header
LB: loop body
LE: loop exit
PB: predicated region body
PF: predicated region fallthrough
CT: control target
= control target key end

     0   :  { %9 = vsyncpa [#allocation3], 0  ;;  %s1191_s0 = inlined_call_operand.hbm [shape: f32[2,16,128], index: 0, kind: input, shape index: {}]   ;;  %s1192_s1 = inlined_call_operand.vmem [shape: f32[2,4,16], index: 1, kind: input, shape index: {}]   ;;  %s1193_s2 = inlined_call_operand.vmem [shape: f32[2,4,128], index: 2, kind: input, shape index: {}]   ;;  %s1194_s3 = inlined_call_operand.vmem [shape: s32[2,3,128], index: 3, kind: input, shape index: {}]   ;;  %s1195_s4 = inlined_call_operand.hbm [shape: f32[1,8], index: 4, kind: output, shape index: {}]  }
   0x1   :  { %10 = vsyncpa [#allocation4], 0  ;;  %s894_s15 = smov [#allocation2]  }
   0x2   :  { %s16_s16 = sshll.u32 %s894_s15, 4  ;;  %s17_s16 = int_to_ptr.vmem [resolvable:$true] %s16_s16 }
   0x3   :  { %s870_s17 = scalar_lea.vmem %s17_s16, 512  ;;  %p875_p1 = scmp.lt.s32.totalorder %s17_s16, %s17_s16 }
   0x4   :  { %p871_p0 = scmp.ne.s32.totalorder %s17_s16, %s870_s17  ;;  %p876_p2 = scmp.lt.s32.totalorder %s870_s17, %s870_s17 }
   0x6   :  { %p877_p3 = por %p876_p2, %p875_p1 }
   0x8   :  { %p878_p4 = pnand %p877_p3, %p871_p0 }
   0xa   :  { %881 = shalt.err (!%p878_p4)
}
   0xb   :  { %s895_s18 = smov 128   ;;  %s896_s19 = smov 8  }
   0xc   :  { %22 = dma.hbm_to_vmem [thread:$0]  %s1191_s0, 512, %s17_s16, [#allocation3], %s895_s18, %s895_s18, %s896_s19  }
   0xd   :  { %890 = dma.done.wait [#allocation3], 512  }
   0xe   :  { %891 = vsyncadd [#allocation3], 4294966784  ;;  %v57_v0 = vlaneseq  ;;  %v897_v1 = vmov 0.0   ;;  %vm898_vm0 = vmmov 0   ;;  %v938_v4 = vld [vmem:[#allocation2] sm:$0xff]  ;;  %v940_v5 = vld [vmem:[#allocation2 + $0x10] sm:$0xff] }
   0xf   :  { %802 = vmatprep.subr.mxu0 %v897_v1  ;;  %809 = vmatprep.subr.mxu1 %v897_v1  ;;  %v951_v8 = vld [vmem:[%s1194_s3] sm:$0x7]  ;;  %v956_v9 = vld [vmem:[%s1194_s3 + $0x4] sm:$0x7]  ;;  %v958_v10 = vld [vmem:[#allocation2 + $0x8] sm:$0xff]  ;;  %vm428_vm5 = vcmask 130048  }
  0x10   :  { %v933_v2 = vshrl.u32 %v57_v0, 7  ;;  %806 = vmatprep.mubr.msk.f32.mxu0 %vm898_vm0, %v897_v1  ;;  %813 = vmatprep.mubr.msk.f32.mxu1 %vm898_vm0, %v897_v1  ;;  %v960_v11 = vld [vmem:[#allocation2 + $0x18] sm:$0xff]  ;;  %v780_v13 = vadd.s32 4294967292, %v951_v8  ;;  %v781_v15 = vadd.s32 4294967292, %v956_v9  ;;  %v899_v20 = vmov 1.0   ;;  %s901_s12 = smov [#allocation5]  }
  0x11   :  { %164 = vmax.xlane.f32.xlu0 %v938_v4  ;;  %168 = vmax.xlane.f32.xlu1 %v940_v5  ;;  %v36_v21 = vld [vmem:[%s1192_s1] sm:$0xf]  ;;  %v37_v22 = vld [vmem:[%s1192_s1 + $0x4] sm:$0xf]  ;;  %v205_v43 = vand.u32 127, %v57_v0  ;;  %vm51_vm10 = vcmp.ge.s32.totalorder %v951_v8, 0 }
  0x12   :  { %v62_v3 = vsub.s32 1, %v933_v2  ;;  %v98_v6 = vsub.s32 0, %v933_v2  ;;  %v944_v7 = vadd.s32 8, %v933_v2  ;;  %vm390_vm11 = vcmask 1041409  }
  0x13   :  { %v1017_v44 = vcvt.s32.f32 %v205_v43  ;;  %vm52_vm12 = vcmp.ge.s32.totalorder %v956_v9, 0  ;;  %vm44_vm13 = vcmask 1042434  }
  0x14   :  { %v63_v12 = vrot.slane %v951_v8, %v62_v3  ;;  %v965_v14 = vrot.slane %v956_v9, %v62_v3  ;;  %v99_v16 = vrot.slane %v780_v13, %v98_v6  ;;  %v103_v17 = vrot.slane %v781_v15, %v98_v6 }
  0x15   :  { %166 = vmax.xlane.f32.xlu0 %v958_v10  ;;  %170 = vmax.xlane.f32.xlu1 %v960_v11 }
  0x16   :  { %vm68_vm1 = vcmp.eq.s32.totalorder %v63_v12, %v933_v2  ;;  %vm69_vm2 = vcmp.eq.s32.totalorder %v63_v12, %v944_v7  ;;  %vm70_vm3 = vcmp.eq.s32.totalorder %v965_v14, %v933_v2  ;;  %vm71_vm4 = vcmp.eq.s32.totalorder %v965_v14, %v944_v7 }
  0x17   :  { %v104_v18 = vsel %vm68_vm1, %v99_v16, 0  ;;  %v105_v19 = vsel %vm69_vm2, %v99_v16, 0  ;;  %803 = vmatpush3.msk.msra.mxu0 %vm69_vm2, %v899_v20  ;;  %810 = vmatpush3.msk.msra.mxu1 %vm71_vm4, %v899_v20  ;;  %v106_v27 = vsel %vm70_vm3, %v103_v17, 0  ;;  %v107_v34 = vsel %vm71_vm4, %v103_v17, 0 }
  0x18   :  { %v109_v23 = vshrl.u32 %v104_v18, 16  ;;  %v121_v24 = vshrl.u32 %v105_v19, 16  ;;  %v108_v25 = vand.u32 65535, %v104_v18  ;;  %v120_v26 = vand.u32 65535, %v105_v19  ;;  %804 = vmatprep.subr.mxu0 %v897_v1  ;;  %811 = vmatprep.subr.mxu1 %v897_v1 }
  0x19   :  { %805 = vmatpush3.msk.msra.mxu0 %vm68_vm1, %v899_v20  ;;  %812 = vmatpush3.msk.msra.mxu1 %vm70_vm3, %v899_v20  ;;  %v133_v32 = vshrl.u32 %v106_v27, 16  ;;  %v132_v33 = vand.u32 65535, %v106_v27  ;;  %v145_v37 = vshrl.u32 %v107_v34, 16  ;;  %v144_v38 = vand.u32 65535, %v107_v34 }
  0x1a   :  { %v111_v28 = vcvt.s32.f32 %v109_v23  ;;  %v123_v29 = vcvt.s32.f32 %v121_v24  ;;  %807 = vmatmul.mubr.msk.f32.vlgmr.msra.gmra.mxu0 %vm428_vm5, %v36_v21  ;;  %814 = vmatmul.mubr.msk.f32.vlgmr.msra.gmra.mxu1 %vm428_vm5, %v37_v22  ;;  %v110_v30 = vcvt.s32.f32 %v108_v25  ;;  %v122_v31 = vcvt.s32.f32 %v120_v26 }
  0x1b   :  { %v135_v35 = vcvt.s32.f32 %v133_v32  ;;  %v134_v36 = vcvt.s32.f32 %v132_v33  ;;  %v147_v39 = vcvt.s32.f32 %v145_v37  ;;  %v146_v40 = vcvt.s32.f32 %v144_v38 }
  0x1c   :  { %114 = vadd.xlane.f32.xlu0 %v111_v28  ;;  %126 = vadd.xlane.f32.xlu1 %v123_v29  ;;  %v775_v41 = vsel %vm68_vm1, 1.0, %v897_v1  ;;  %v776_v42 = vsel %vm69_vm2, 1.0, %v897_v1  ;;  %v1059_v38 = vsel %vm51_vm10, 1.0, %v897_v1  ;;  %vm579_vm2 = vcmask 1043456  }
  0x1d   :  { %v391_v43 = vsel %vm390_vm11, %v1059_v38, 0.0  ;;  %vm730_vm5 = vcmask 1040384  }
  0x20   :  { %112 = vadd.xlane.f32.xlu0 %v110_v30  ;;  %124 = vadd.xlane.f32.xlu1 %v122_v31 }
  0x24   :  { %138 = vadd.xlane.f32.xlu0 %v135_v35  ;;  %136 = vadd.xlane.f32.xlu1 %v134_v36  ;;  %v777_v36 = vsel %vm70_vm3, 1.0, %v897_v1  ;;  %vm672_vm3 = vcmp.gt.f32.partialorder %v1059_v38, 0.5 }
  0x28   :  { %150 = vadd.xlane.f32.xlu0 %v147_v39  ;;  %148 = vadd.xlane.f32.xlu1 %v146_v40 }
  0x2c   :  { %80 = vadd.xlane.f32.xlu1 %v775_v41  ;;  %82 = vadd.xlane.f32.xlu0 %v776_v42 }
  0x9a   :  { %v1019_v45 = vpop.xlane.xlu0 %164  ;;  %v1021_v46 = vpop.xlane.xlu1 %168 }
  0x9b   :  { %v172_v47 = vsub.f32 %v938_v4, %v1019_v45  ;;  %vm304_vm6 = vcmp.eq.f32.partialorder %v938_v4, %v1019_v45  ;;  %v174_v48 = vsub.f32 %v940_v5, %v1021_v46  ;;  %vm306_vm7 = vcmp.eq.f32.partialorder %v940_v5, %v1021_v46 }
  0x9c   :  { %v308_v49 = vsel %vm304_vm6, %v1017_v44, 128.0  ;;  %v310_v53 = vsel %vm306_vm7, %v1017_v44, 128.0  ;;  %vm89_vm6 = vcmp.lt.s32.totalorder %v944_v7, 10 }
  0x9d   :  { %v176_v50 = vmul.f32 1.442695, %v172_v47  ;;  %312 = vmin.xlane.f32.xlu1 %v308_v49  ;;  %v180_v51 = vmul.f32 1.442695, %v174_v48  ;;  %v778_v47 = vsel %vm71_vm4, 1.0, %v897_v1  ;;  %v42_v48 = vcvt.s32.f32 %v951_v8 }
  0x9e   :  { %v1032_v52 = vpop.xlane.xlu0 %166  ;;  %v1035_v54 = vpop.xlane.xlu1 %170 }
  0x9f   :  { %838 = vpow2.f32 %v176_v50  ;;  %v173_v55 = vsub.f32 %v958_v10, %v1032_v52  ;;  %vm305_vm8 = vcmp.eq.f32.partialorder %v958_v10, %v1032_v52  ;;  %v175_v56 = vsub.f32 %v960_v11, %v1035_v54 }
  0xa0   :  { %v309_v57 = vsel %vm305_vm8, %v1017_v44, 128.0  ;;  %vm307_vm9 = vcmp.eq.f32.partialorder %v960_v11, %v1035_v54  ;;  %840 = vpow2.f32 %v180_v51  ;;  %v1075_v51 = vsel %vm52_vm12, 1.0, %v897_v1 }
  0xa1   :  { %v178_v58 = vmul.f32 1.442695, %v173_v55  ;;  %316 = vmin.xlane.f32.xlu1 %v310_v53  ;;  %314 = vmin.xlane.f32.xlu0 %v309_v57  ;;  %v182_v59 = vmul.f32 1.442695, %v175_v56  ;;  %v311_v60 = vsel %vm307_vm9, %v1017_v44, 128.0  ;;  %v45_v8 = vsel %vm44_vm13, %v42_v48, -inf }
  0xa2   :  { %v394_v14 = vsel %vm390_vm11, %v1075_v51, 0.0  ;;  %v43_v57 = vcvt.s32.f32 %v956_v9  ;;  %vm673_vm4 = vcmp.gt.f32.partialorder %v1075_v51, 0.5 }
  0xa3   :  { %842 = vpow2.f32 %v178_v58 }
  0xa4   :  { %844 = vpow2.f32 %v182_v59 }
  0xa5   :  { %v115_v61 = vpop.xlane.xlu0 %114  ;;  %v127_v62 = vpop.xlane.xlu1 %126  ;;  %318 = vmin.xlane.f32.xlu0 %v311_v60 }
  0xa6   :  { %v117_v63 = vcvt.f32.s32 %v115_v61  ;;  %v129_v0 = vcvt.f32.s32 %v127_v62  ;;  %v48_v62 = vsel %vm44_vm13, %v43_v57, -inf }
  0xa8   :  { %v118_v3 = vshll.u32 %v117_v63, 16  ;;  %v130_v13 = vshll.u32 %v129_v0, 16 }
  0xa9   :  { %v113_v6 = vpop.xlane.xlu0 %112  ;;  %v125_v12 = vpop.xlane.xlu1 %124 }
  0xaa   :  { %v116_v15 = vcvt.f32.s32 %v113_v6  ;;  %v128_v16 = vcvt.f32.s32 %v125_v12 }
  0xac   :  { %v839_v17 = vpop.eup %838  ;;  %v119_v18 = vadd.s32 %v118_v3, %v116_v15  ;;  %v131_v22 = vadd.s32 %v130_v13, %v128_v16 }
  0xad   :  { %v139_v19 = vpop.xlane.xlu0 %138  ;;  %v137_v21 = vpop.xlane.xlu1 %136  ;;  %184 = vadd.xlane.f32.xlu0 %v839_v17 }
  0xae   :  { %v141_v23 = vcvt.f32.s32 %v139_v19  ;;  %v140_v24 = vcvt.f32.s32 %v137_v21  ;;  %v841_v25 = vpop.eup %840  ;;  %v1047_v28 = vadd.s32 4, %v119_v18  ;;  %v1050_v31 = vadd.s32 4, %v131_v22 }
  0xb0   :  { %v142_v26 = vshll.u32 %v141_v23, 16  ;;  %v843_v27 = vpop.eup %842  ;;  %v160_v40 = vcvt.s32.f32 %v1047_v28  ;;  %v161_v41 = vcvt.s32.f32 %v1050_v31 }
  0xb1   :  { %v151_v29 = vpop.xlane.xlu0 %150  ;;  %v149_v30 = vpop.xlane.xlu1 %148  ;;  %188 = vadd.xlane.f32.xlu0 %v841_v25  ;;  %186 = vadd.xlane.f32.xlu1 %v843_v27 }
  0xb2   :  { %v143_v32 = vadd.s32 %v142_v26, %v140_v24  ;;  %v153_v33 = vcvt.f32.s32 %v151_v29  ;;  %v152_v34 = vcvt.f32.s32 %v149_v30  ;;  %v845_v35 = vpop.eup %844  ;;  %vm208_vm14 = vcmp.eq.f32.partialorder %v1017_v44, %v161_v41 }
  0xb3   :  { %vm207_vm15 = vcmp.eq.f32.partialorder %v1017_v44, %v160_v40  ;;  %v783_v55 = vsel %vm208_vm14, 1.0, %v897_v1  ;;  %vm267_vm14 = vcmask 7168  }
  0xb4   :  { %v1056_v37 = vadd.s32 4, %v143_v32  ;;  %v154_v39 = vshll.u32 %v153_v33, 16  ;;  %v782_v56 = vsel %vm207_vm15, 1.0, %v897_v1  ;;  %v220_v59 = vmul.f32 %v783_v55, %v958_v10  ;;  %v39_v10 = vld [vmem:[%s1193_s2 + $0x4] sm:$0xf] }
  0xb5   :  { %84 = vadd.xlane.f32.xlu0 %v777_v36  ;;  %190 = vadd.xlane.f32.xlu1 %v845_v35  ;;  %v219_v60 = vmul.f32 %v782_v56, %v938_v4  ;;  %v38_v4 = vld [vmem:[%s1193_s2] sm:$0xf]  ;;  %v605_v0 = vmul.f32 0.5, %v39_v10  ;;  %s900_s2 = smov 0.0  }
  0xb6   :  { %v155_v42 = vadd.s32 %v154_v39, %v152_v34  ;;  %v162_v49 = vcvt.s32.f32 %v1056_v37  ;;  %758 = sst [smem:[#allocation5 + $0x7]] %s900_s2 }
  0xb7   :  { %v609_v3 = vrot.slane %v605_v0, 2 }
  0xb8   :  { %v1072_v50 = vadd.s32 4, %v155_v42  ;;  %vm209_vm0 = vcmp.eq.f32.partialorder %v1017_v44, %v162_v49 }
  0xb9   :  { %392 = vadd.xlane.f32.xlu0 %v391_v43  ;;  %86 = vadd.xlane.f32.xlu1 %v778_v47  ;;  %v784_v58 = vsel %vm209_vm0, 1.0, %v897_v1  ;;  %v613_v15 = vsub.f32 %v39_v10, %v609_v3  ;;  %v615_v17 = vadd.f32 %v609_v3, %v39_v10  ;;  %vm415_vm0 = vcmask 0  }
  0xba   :  { %v163_v53 = vcvt.s32.f32 %v1072_v50  ;;  %v221_v61 = vmul.f32 %v784_v58, %v940_v5 }
  0xbb   :  { %v627_v25 = vsub.f32 %v615_v17, %v613_v15 }
  0xbc   :  { %vm210_vm1 = vcmp.eq.f32.partialorder %v1017_v44, %v163_v53  ;;  %v604_v44 = vmul.f32 0.5, %v38_v4 }
  0xbd   :  { %46 = vmax.xlane.f32.xlu0 %v45_v8  ;;  %395 = vadd.xlane.f32.xlu1 %v394_v14  ;;  %v785_v63 = vsel %vm210_vm1, 1.0, %v897_v1  ;;  %v631_v43 = vrot.slane %v627_v25, 1 }
  0xbe   :  { %v222_v9 = vmul.f32 %v785_v63, %v960_v11  ;;  %v608_v5 = vrot.slane %v604_v44, 2 }
  0xbf   :  { %v635_v0 = vmul.f32 %v631_v43, %v627_v25 }
  0xc0   :  { %v612_v13 = vsub.f32 %v38_v4, %v608_v5  ;;  %v614_v16 = vadd.f32 %v608_v5, %v38_v4 }
  0xc1   :  { %225 = vadd.xlane.f32.xlu1 %v220_v59  ;;  %223 = vadd.xlane.f32.xlu0 %v219_v60 }
  0xc2   :  { %v626_v24 = vsub.f32 %v614_v16, %v612_v13 }
  0xc4   :  { %v630_v42 = vrot.slane %v626_v24, 1 }
  0xc5   :  { %49 = vmax.xlane.f32.xlu0 %v48_v62  ;;  %227 = vadd.xlane.f32.xlu1 %v221_v61 }
  0xc6   :  { %v634_v44 = vmul.f32 %v630_v42, %v626_v24 }
  0xc9   :  { %229 = vadd.xlane.f32.xlu1 %v222_v9 }
  0xda   :  { %v498_v6 = vpop.f32.mrf.mxu0  ;;  %v571_v12 = vpop.f32.mrf.mxu1 }
  0xdb   :  { %v592_v11 = vmul.f32 0.5, %v498_v6  ;;  %v593_v18 = vmul.f32 0.5, %v571_v12  ;;  %v575_v19 = vsub.f32 %v498_v6, %v38_v4  ;;  %v576_v21 = vsub.f32 %v571_v12, %v39_v10 }
  0xdc   :  { %v808_v22 = vpop.f32.mrf.mxu0  ;;  %v815_v23 = vpop.f32.mrf.mxu1 }
  0xdd   :  { %v596_v26 = vrot.slane %v592_v11, 2  ;;  %v597_v27 = vrot.slane %v593_v18, 2  ;;  %v577_v29 = vand.u32 2147483647, %v575_v19  ;;  %v578_v30 = vand.u32 2147483647, %v576_v21 }
  0xdf   :  { %v600_v32 = vsub.f32 %v498_v6, %v596_v26  ;;  %v602_v33 = vadd.f32 %v596_v26, %v498_v6  ;;  %v601_v34 = vsub.f32 %v571_v12, %v597_v27  ;;  %v603_v35 = vadd.f32 %v597_v27, %v571_v12 }
  0xe0   :  { %v580_v36 = vsel %vm579_vm2, %v577_v29, 0.0  ;;  %v581_v39 = vsel %vm579_vm2, %v578_v30, 0.0 }
  0xe1   :  { %v616_v47 = vsub.f32 %v602_v33, %v600_v32  ;;  %v617_v48 = vsub.f32 %v603_v35, %v601_v34  ;;  %v1109_v8 = vadd.f32 %v581_v39, %v580_v36  ;;  %v656_v14 = vmin.f32 %v600_v32, %v612_v13 }
  0xe2   :  { %v657_v55 = vmin.f32 %v601_v34, %v613_v15  ;;  %v658_v56 = vmax.f32 %v602_v33, %v614_v16  ;;  %v659_v57 = vmax.f32 %v603_v35, %v615_v17  ;;  %v636_v58 = vmax.f32 %v600_v32, %v612_v13 }
  0xe3   :  { %v620_v59 = vrot.slane %v616_v47, 1  ;;  %v621_v60 = vrot.slane %v617_v48, 1  ;;  %v637_v61 = vmax.f32 %v601_v34, %v613_v15  ;;  %v638_v62 = vmin.f32 %v602_v33, %v614_v16 }
  0xe4   :  { %v639_v63 = vmin.f32 %v603_v35, %v615_v17  ;;  %v660_v9 = vsub.f32 %v658_v56, %v656_v14  ;;  %v661_v4 = vsub.f32 %v659_v57, %v657_v55 }
  0xe5   :  { %v624_v10 = vmul.f32 %v620_v59, %v616_v47  ;;  %v640_v5 = vsub.f32 %v638_v62, %v636_v58  ;;  %v625_v3 = vmul.f32 %v621_v60, %v617_v48 }
  0xe6   :  { %v641_v6 = vsub.f32 %v639_v63, %v637_v61  ;;  %v662_v12 = vmax.f32 %v660_v9, 0.0  ;;  %v663_v11 = vmax.f32 %v661_v4, 0.0 }
  0xe7   :  { %v642_v18 = vmax.f32 %v640_v5, 0.0  ;;  %v652_v23 = vadd.f32 %v634_v44, %v624_v10  ;;  %v653_v15 = vadd.f32 %v635_v0, %v625_v3 }
  0xe8   :  { %v643_v19 = vmax.f32 %v641_v6, 0.0  ;;  %v666_v21 = vrot.slane %v662_v12, 1  ;;  %v667_v22 = vrot.slane %v663_v11, 1 }
  0xe9   :  { %v646_v13 = vrot.slane %v642_v18, 1 }
  0xea   :  { %v647_v26 = vrot.slane %v643_v19, 1  ;;  %v670_v16 = vmul.f32 %v666_v21, %v662_v12  ;;  %v671_v17 = vmul.f32 %v667_v22, %v663_v11 }
  0xeb   :  { %v650_v24 = vmul.f32 %v646_v13, %v642_v18  ;;  %v1117_v13 = vpop.xlane.xlu1 %80 }
  0xec   :  { %v651_v25 = vmul.f32 %v647_v26, %v643_v19  ;;  %v684_v27 = vrot.slane %v670_v16, 7  ;;  %v685_v29 = vrot.slane %v671_v17, 7 }
  0xed   :  { %v654_v30 = vsub.f32 %v652_v23, %v650_v24  ;;  %v1119_v23 = vpop.xlane.xlu0 %82 }
  0xee   :  { %v655_v32 = vsub.f32 %v653_v15, %v651_v25  ;;  %v688_v33 = vsel %vm672_vm3, %v684_v27, 1.0  ;;  %v689_v34 = vsel %vm673_vm4, %v685_v29, 1.0 }
  0xef   :  { %v676_v35 = vrot.slane %v654_v30, 7  ;;  %v704_v36 = vrot.slane %v688_v33, 1  ;;  %v705_v39 = vrot.slane %v689_v34, 1  ;;  %v700_v55 = vsub.f32 %v670_v16, %v654_v30 }
  0xf0   :  { %v677_v42 = vrot.slane %v655_v32, 7  ;;  %v701_v56 = vsub.f32 %v671_v17, %v655_v32 }
  0xf1   :  { %v680_v43 = vsel %vm672_vm3, %v676_v35, 1.0  ;;  %846 = vrcp.f32 %v704_v36 }
  0xf2   :  { %v681_v47 = vsel %vm673_vm4, %v677_v42, 1.0  ;;  %v692_v48 = vrot.slane %v680_v43, 1  ;;  %848 = vrcp.f32 %v705_v39 }
  0xf3   :  { %v693_v14 = vrot.slane %v681_v47, 1 }
  0xf4   :  { %850 = vrcp.f32 %v692_v48 }
  0xf5   :  { %852 = vrcp.f32 %v693_v14  ;;  %v236_v14 = vsub.f32 1.0, %v1119_v23 }
  0xfe   :  { %v847_v57 = vpop.eup %846 }
  0xff   :  { %v849_v58 = vpop.eup %848  ;;  %v709_v59 = vmul.f32 %v847_v57, %v700_v55 }
 0x100   :  { %v711_v61 = vmul.f32 %v849_v58, %v701_v56 }
 0x101   :  { %v851_v60 = vpop.eup %850 }
 0x102   :  { %v853_v62 = vpop.eup %852  ;;  %v697_v63 = vmul.f32 %v851_v60, %v650_v24 }
 0x103   :  { %v699_v9 = vmul.f32 %v853_v62, %v651_v25 }
 0x104   :  { %v712_v4 = vsub.f32 %v697_v63, %v709_v59 }
 0x105   :  { %v713_v10 = vsub.f32 %v699_v9, %v711_v61 }
 0x106   :  { %v714_v44 = vsub.f32 1.0, %v712_v4 }
 0x107   :  { %v715_v0 = vsub.f32 1.0, %v713_v10 }
 0x108   :  { %v718_v5 = vrot.slane %v714_v44, 7  ;;  %v257_v44 = vsub.s32 2, %v933_v2 }
 0x109   :  { %v719_v3 = vrot.slane %v715_v0, 7 }
 0x10a   :  { %v722_v6 = vmul.f32 %v1059_v38, %v718_v5  ;;  %v1123_v38 = vsel %vm89_vm6, 1.0, %v897_v1 }
 0x10b   :  { %v723_v12 = vmul.f32 %v1075_v51, %v719_v3 }
 0x10c   :  { %v726_v11 = vrot.slane %v722_v6, 1 }
 0x10d   :  { %v727_v18 = vrot.slane %v723_v12, 1 }
 0x10e   :  { %v731_v19 = vsel %vm730_vm5, %v726_v11, 0.0 }
 0x10f   :  { %v732_v21 = vsel %vm730_vm5, %v727_v18, 0.0 }
 0x110   :  { %v1115_v22 = vadd.f32 %v732_v21, %v731_v19 }
 0x126   :  { %v313_v26 = vpop.xlane.xlu1 %312 }
 0x127   :  { %vm368_vm7 = vcmp.eq.f32.partialorder %v313_v26, 4.0  ;;  %vm320_vm12 = vcmp.eq.f32.partialorder %v313_v26, %v160_v40  ;;  %v235_v40 = vsub.f32 1.0, %v1117_v13 }
 0x128   :  { %v372_v16 = vsel %vm368_vm7, 0.0, %v899_v20  ;;  %v786_v48 = vsel %vm320_vm12, 1.0, %v897_v1 }
 0x129   :  { %v332_v55 = vmul.f32 %v786_v48, %v1117_v13  ;;  %v239_v62 = vmul.f32 0.1, %v235_v40 }
 0x12a   :  { %v317_v15 = vpop.xlane.xlu1 %316  ;;  %v315_v51 = vpop.xlane.xlu0 %314 }
 0x12b   :  { %vm369_vm8 = vcmp.eq.f32.partialorder %v315_v51, 4.0  ;;  %vm370_vm9 = vcmp.eq.f32.partialorder %v317_v15, 4.0  ;;  %vm321_vm11 = vcmp.eq.f32.partialorder %v315_v51, %v161_v41  ;;  %vm322_vm13 = vcmp.eq.f32.partialorder %v317_v15, %v162_v49 }
 0x12c   :  { %v373_v17 = vsel %vm369_vm8, 0.0, %v1123_v38  ;;  %v374_v27 = vsel %vm370_vm9, 0.0, %v899_v20  ;;  %v787_v20 = vsel %vm321_vm11, 1.0, %v897_v1  ;;  %v788_v56 = vsel %vm322_vm13, 1.0, %v897_v1 }
 0x12d   :  { %v376_v24 = vadd.f32 %v373_v17, %v372_v16  ;;  %v333_v31 = vmul.f32 %v787_v20, %v1119_v23  ;;  %v240_v49 = vmul.f32 0.1, %v236_v14  ;;  %v336_v63 = vsel %vm267_vm14, %v332_v55, 0.0 }
 0x12e   :  { %v319_v25 = vpop.xlane.xlu0 %318 }
 0x12f   :  { %vm371_vm10 = vcmp.eq.f32.partialorder %v319_v25, 4.0  ;;  %v377_v29 = vrot.slane %v376_v24, 4  ;;  %vm323_vm15 = vcmp.eq.f32.partialorder %v319_v25, %v163_v53  ;;  %v337_v59 = vsel %vm267_vm14, %v333_v31, 0.0 }
 0x130   :  { %v375_v7 = vsel %vm371_vm10, 0.0, %v1123_v38  ;;  %v789_v9 = vsel %vm323_vm15, 1.0, %v897_v1  ;;  %v244_v6 = vadd.f32 %v240_v49, %v1119_v23  ;;  %v338_v11 = vadd.f32 %v337_v59, %v336_v63 }
 0x131   :  { %v383_v30 = vadd.f32 %v375_v7, %v374_v27  ;;  %v378_v32 = vadd.f32 %v377_v29, %v376_v24  ;;  %v243_v25 = vadd.f32 %v239_v62, %v1117_v13 }
 0x133   :  { %v384_v33 = vrot.slane %v383_v30, 4  ;;  %v379_v35 = vrot.slane %v378_v32, 2 }
 0x135   :  { %v385_v34 = vadd.f32 %v384_v33, %v383_v30  ;;  %v380_v39 = vadd.f32 %v379_v35, %v378_v32  ;;  %v248_v32 = vmul.f32 %v1123_v38, %v244_v6 }
 0x136   :  { %v185_v36 = vpop.xlane.xlu0 %184 }
 0x137   :  { %854 = vlog2.f32 %v185_v36  ;;  %v386_v42 = vrot.slane %v385_v34, 2  ;;  %v381_v41 = vrot.slane %v380_v39, 1 }
 0x139   :  { %v387_v28 = vadd.f32 %v386_v42, %v385_v34  ;;  %v382_v60 = vadd.f32 %v381_v41, %v380_v39 }
 0x13a   :  { %v187_v43 = vpop.xlane.xlu1 %186  ;;  %v189_v47 = vpop.xlane.xlu0 %188 }
 0x13b   :  { %856 = vlog2.f32 %v187_v43  ;;  %v388_v61 = vrot.slane %v387_v28, 1 }
 0x13c   :  { %858 = vlog2.f32 %v189_v47 }
 0x13d   :  { %v389_v21 = vadd.f32 %v388_v61, %v387_v28 }
 0x13e   :  { %v191_v57 = vpop.xlane.xlu1 %190  ;;  %v1142_v58 = vpop.xlane.xlu0 %84 }
 0x13f   :  { %860 = vlog2.f32 %v191_v57  ;;  %v334_v37 = vmul.f32 %v788_v56, %v1142_v58  ;;  %v237_v12 = vsub.f32 1.0, %v1142_v58 }
 0x141   :  { %v339_v5 = vsel %vm267_vm14, %v334_v37, 0.0  ;;  %v241_v29 = vmul.f32 0.1, %v237_v12 }
 0x142   :  { %v1150_v4 = vpop.xlane.xlu1 %86  ;;  %v393_v10 = vpop.xlane.xlu0 %392  ;;  %v340_v2 = vadd.f32 %v339_v5, %v338_v11 }
 0x143   :  { %v238_v50 = vsub.f32 1.0, %v1150_v4  ;;  %v397_v53 = vsub.f32 %v382_v60, %v393_v10  ;;  %v335_v0 = vmul.f32 %v789_v9, %v1150_v4  ;;  %v245_v28 = vadd.f32 %v241_v29, %v1142_v58 }
 0x144   :  { %v855_v3 = vpop.eup %854 }
 0x145   :  { %v193_v18 = vmul.f32 0.6931472, %v855_v3  ;;  %v242_v1 = vmul.f32 0.1, %v238_v50  ;;  %v399_v19 = vand.u32 2147483647, %v397_v53 }
 0x146   :  { %v396_v26 = vpop.xlane.xlu1 %395  ;;  %v47_v15 = vpop.xlane.xlu0 %46  ;;  %v341_v51 = vsel %vm267_vm14, %v335_v0, 0.0  ;;  %v353_v50 = vsel %vm267_vm14, %v1119_v23, 0.0 }
 0x147   :  { %v403_v16 = vrot.slane %v399_v19, 7  ;;  %v398_v17 = vsub.f32 %v389_v21, %v396_v26  ;;  %v258_v24 = vrot.slane %v47_v15, %v257_v44  ;;  %v246_v7 = vadd.f32 %v242_v1, %v1150_v4 }
 0x148   :  { %v857_v27 = vpop.eup %856  ;;  %v342_v30 = vadd.f32 %v341_v51, %v340_v2  ;;  %v200_v36 = vadd.f32 %v193_v18, %v1019_v45 }
 0x149   :  { %v859_v33 = vpop.eup %858  ;;  %v195_v34 = vmul.f32 0.6931472, %v857_v27  ;;  %v400_v35 = vand.u32 2147483647, %v398_v17  ;;  %v407_v42 = vmul.f32 %v403_v16, %v47_v15  ;;  %v285_v43 = vmul.f32 %v258_v24, %v248_v32 }
 0x14a   :  { %v197_v39 = vmul.f32 0.6931472, %v859_v33  ;;  %343 = vadd.xlane.f32.xlu0 %v342_v30  ;;  %v226_v20 = vpop.xlane.xlu1 %225  ;;  %v284_v47 = vmul.f32 %v258_v24, %v243_v25  ;;  %v224_v48 = vpop.xlane.xlu0 %223  ;;  %v250_v40 = vmul.f32 %v1123_v38, %v246_v7  ;;  %v352_v38 = vsel %vm267_vm14, %v1117_v13, 0.0 }
 0x14b   :  { %v201_v14 = vadd.f32 %v195_v34, %v1032_v52  ;;  %v231_v31 = vsub.f32 %v200_v36, %v224_v48  ;;  %v404_v37 = vrot.slane %v400_v35, 7  ;;  %v411_v49 = vrot.slane %v407_v42, 2 }
 0x14c   :  { %v861_v41 = vpop.eup %860  ;;  %v202_v45 = vadd.f32 %v197_v39, %v1021_v46  ;;  %v288_v61 = vsel %vm267_vm14, %v284_v47, 0.0  ;;  %v289_v52 = vsel %vm267_vm14, %v285_v43, 0.0  ;;  %v357_v27 = vsel %vm267_vm14, %v1150_v4, 0.0 }
 0x14d   :  { %v199_v55 = vmul.f32 0.6931472, %v861_v41  ;;  %v232_v56 = vsub.f32 %v201_v14, %v226_v20  ;;  %v251_v57 = vmul.f32 %v243_v25, %v231_v31  ;;  %v416_v18 = vsel %vm415_vm0, %v411_v49, 0.0 }
 0x14e   :  { %v228_v59 = vpop.xlane.xlu1 %227  ;;  %v50_v60 = vpop.xlane.xlu0 %49  ;;  %v290_v1 = vadd.f32 %v289_v52, %v288_v61 }
 0x14f   :  { %v252_v62 = vmul.f32 %v248_v32, %v232_v56  ;;  %v263_v63 = vmul.f32 %v258_v24, %v251_v57  ;;  %v233_v9 = vsub.f32 %v202_v45, %v228_v59  ;;  %v262_v10 = vrot.slane %v50_v60, %v257_v44 }
 0x150   :  { %v408_v53 = vmul.f32 %v404_v37, %v50_v60  ;;  %v203_v46 = vadd.f32 %v199_v55, %v1035_v54  ;;  %v355_v44 = vsel %vm267_vm14, %v1142_v58, 0.0  ;;  %v354_v58 = vadd.f32 %v353_v50, %v352_v38 }
 0x151   :  { %v264_v0 = vmul.f32 %v258_v24, %v252_v62  ;;  %v253_v5 = vmul.f32 %v245_v28, %v233_v9  ;;  %v286_v3 = vmul.f32 %v262_v10, %v245_v28  ;;  %v287_v6 = vmul.f32 %v262_v10, %v250_v40 }
 0x152   :  { %v412_v12 = vrot.slane %v408_v53, 2  ;;  %v230_v11 = vpop.xlane.xlu1 %229  ;;  %v268_v23 = vsel %vm267_vm14, %v263_v63, 0.0  ;;  %v356_v7 = vadd.f32 %v355_v44, %v354_v58 }
 0x153   :  { %v234_v19 = vsub.f32 %v203_v46, %v230_v11  ;;  %v291_v13 = vsel %vm267_vm14, %v286_v3, 0.0  ;;  %v265_v21 = vmul.f32 %v262_v10, %v253_v5  ;;  %v293_v15 = vsel %vm267_vm14, %v287_v6, 0.0 }
 0x154   :  { %v417_v54 = vsel %vm415_vm0, %v412_v12, 0.0  ;;  %v292_v26 = vadd.f32 %v291_v13, %v290_v1  ;;  %v269_v2 = vsel %vm267_vm14, %v264_v0, 0.0  ;;  %v358_v33 = vadd.f32 %v357_v27, %v356_v7 }
 0x155   :  { %v254_v51 = vmul.f32 %v250_v40, %v234_v19  ;;  %v418_v16 = vadd.f32 %v417_v54, %v416_v18  ;;  %v270_v17 = vadd.f32 %v269_v2, %v268_v23  ;;  %v271_v24 = vsel %vm267_vm14, %v265_v21, 0.0 }
 0x156   :  { %v294_v25 = vadd.f32 %v293_v15, %v292_v26 }
 0x157   :  { %419 = vadd.xlane.f32.xlu0 %v418_v16  ;;  %v266_v29 = vmul.f32 %v262_v10, %v254_v51  ;;  %v272_v30 = vadd.f32 %v271_v24, %v270_v17 }
 0x158   :  { %295 = vadd.xlane.f32.xlu1 %v294_v25 }
 0x159   :  { %v273_v32 = vsel %vm267_vm14, %v266_v29, 0.0 }
 0x15a   :  { %v274_v34 = vadd.f32 %v273_v32, %v272_v30 }
 0x15c   :  { %359 = vadd.xlane.f32.xlu1 %v358_v33  ;;  %275 = vadd.xlane.f32.xlu0 %v274_v34 }
 0x160   :  { %583 = vadd.xlane.f32.xlu1 %v1109_v8  ;;  %734 = vadd.xlane.f32.xlu0 %v1115_v22 }
 0x1d3   :  { %v344_v35 = vpop.xlane.xlu0 %343 }
 0x1d4   :  { %v345_v36 = vrot.slane %v344_v35, 4 }
 0x1d6   :  { %v346_v4 = vadd.f32 %v345_v36, %v344_v35 }
 0x1d8   :  { %v347_v14 = vrot.slane %v346_v4, 2 }
 0x1da   :  { %v348_v49 = vadd.f32 %v347_v14, %v346_v4 }
 0x1dc   :  { %v349_v53 = vrot.slane %v348_v49, 1 }
 0x1de   :  { %v350_v19 = vadd.f32 %v349_v53, %v348_v49 }
 0x1e0   :  { %v420_v39 = vpop.xlane.xlu0 %419 }
 0x1e1   :  { %v421_v42 = vrot.slane %v420_v39, 4  ;;  %v296_v20 = vpop.xlane.xlu1 %295 }
 0x1e2   :  { %v297_v43 = vrot.slane %v296_v20, 4 }
 0x1e3   :  { %v422_v47 = vadd.f32 %v421_v42, %v420_v39 }
 0x1e4   :  { %v298_v48 = vadd.f32 %v297_v43, %v296_v20 }
 0x1e5   :  { %v360_v31 = vpop.xlane.xlu1 %359  ;;  %v276_v41 = vpop.xlane.xlu0 %275  ;;  %v423_v8 = vrot.slane %v422_v47, 2 }
 0x1e6   :  { %v299_v28 = vrot.slane %v298_v48, 2  ;;  %v361_v40 = vrot.slane %v360_v31, 4  ;;  %v277_v55 = vrot.slane %v276_v41, 4 }
 0x1e7   :  { %v424_v62 = vadd.f32 %v423_v8, %v422_v47 }
 0x1e8   :  { %v362_v56 = vadd.f32 %v361_v40, %v360_v31  ;;  %v278_v22 = vadd.f32 %v277_v55, %v276_v41  ;;  %v300_v37 = vadd.f32 %v299_v28, %v298_v48 }
 0x1e9   :  { %v584_v57 = vpop.xlane.xlu1 %583  ;;  %v735_v45 = vpop.xlane.xlu0 %734  ;;  %v425_v18 = vrot.slane %v424_v62, 1 }
 0x1ea   :  { %v363_v59 = vrot.slane %v362_v56, 2  ;;  %v279_v60 = vrot.slane %v278_v22, 2  ;;  %v585_v61 = vrot.slane %v584_v57, 4  ;;  %v736_v52 = vrot.slane %v735_v45, 4 }
 0x1eb   :  { %v301_v50 = vrot.slane %v300_v37, 1  ;;  %v426_v23 = vadd.f32 %v425_v18, %v424_v62 }
 0x1ec   :  { %v586_v63 = vadd.f32 %v585_v61, %v584_v57  ;;  %v737_v9 = vadd.f32 %v736_v52, %v735_v45  ;;  %v280_v10 = vadd.f32 %v279_v60, %v278_v22  ;;  %v364_v38 = vadd.f32 %v363_v59, %v362_v56 }
 0x1ed   :  { %v302_v1 = vadd.f32 %v301_v50, %v300_v37 }
 0x1ee   :  { %v587_v46 = vrot.slane %v586_v63, 2  ;;  %v738_v0 = vrot.slane %v737_v9, 2  ;;  %v281_v5 = vrot.slane %v280_v10, 1  ;;  %v365_v3 = vrot.slane %v364_v38, 1 }
 0x1f0   :  { %v588_v6 = vadd.f32 %v587_v46, %v586_v63  ;;  %v739_v12 = vadd.f32 %v738_v0, %v737_v9  ;;  %v282_v11 = vadd.f32 %v281_v5, %v280_v10  ;;  %v366_v44 = vadd.f32 %v365_v3, %v364_v38 }
 0x1f2   :  { %816 = vpush %v282_v11  ;;  %v589_v13 = vrot.slane %v588_v6, 1  ;;  %v740_v21 = vrot.slane %v739_v12, 1 }
 0x1f3   :  { %818 = vpush %v302_v1 }
 0x1f4   :  { %820 = vpush %v350_v19  ;;  %v590_v54 = vadd.f32 %v589_v13, %v588_v6  ;;  %v741_v26 = vadd.f32 %v740_v21, %v739_v12 }
 0x1f5   :  { %822 = vpush %v366_v44 }
 0x1f6   :  { %824 = vpush %v426_v23 }
 0x1f7   :  { %826 = vpush %v590_v54 }
 0x1f8   :  { %828 = vpush %v741_v26 }
 0x223   :  { %s817_s5 = spop %816 }
 0x224   :  { %744 = sst [smem:[#allocation5]] %s817_s5  ;;  %s819_s6 = spop %818 }
 0x225   :  { %746 = sst [smem:[#allocation5 + $0x1]] %s819_s6  ;;  %s821_s7 = spop %820 }
 0x226   :  { %748 = sst [smem:[#allocation5 + $0x2]] %s821_s7  ;;  %s823_s8 = spop %822 }
 0x227   :  { %750 = sst [smem:[#allocation5 + $0x3]] %s823_s8  ;;  %s825_s9 = spop %824 }
 0x228   :  { %752 = sst [smem:[#allocation5 + $0x4]] %s825_s9  ;;  %s827_s10 = spop %826 }
 0x229   :  { %754 = sst [smem:[#allocation5 + $0x5]] %s827_s10  ;;  %s829_s11 = spop %828 }
 0x22a   :  { %756 = sst [smem:[#allocation5 + $0x6]] %s829_s11 }
 0x22b   :  { %766 = dma.smem_to_hbm %s901_s12, 16, %s1195_s4, [#allocation4]  }
 0x22c   :  { %892 = dma.done.wait [#allocation4], 16  }
 0x22d   :  { %893 = vsyncadd [#allocation4], 4294967280 }
 0x22e   :  { %770 = sfence }
 0x22f   :  { %771 = vsyncpa [#allocation3], 1 }
 0x230   :  { %772 = vsyncpa [#allocation4], 1 }

</bundles_post_ra>
